<compile_context>
chip_gen: v7x
topology: tpu7x:2x2x1
jax: 0.10.0
libtpu: 0.0.40
codegen_flags: <defaults>
</compile_context>

<pallas_src>
import math

import jax
import jax.numpy as jnp
from jax.experimental import pallas as pl
from jax.experimental.pallas import tpu as pltpu

BN_EPS = 1e-5


# --------------------------------------------------------------------------- #
# Kernels
# --------------------------------------------------------------------------- #
def _conv3(x, w_ref, mask_l, mask_r):
    """Width-3 conv over a row-aligned spatial slab.

    x: (Cin, S) tile with flattened spatial (h*W + w) on the lane axis.
    w_ref: (3, Cout, Cin) taps (k = 0/1/2 <-> input offset w-1 / w / w+1).
    mask_l / mask_r: (1, S) multiplicative edge masks — zero where the tap
    would cross an image-row boundary (realizes padding=(0,1) + tile edges).
    Returns (Cout, S) float32.
    """
    s = x.shape[1]
    x_m1 = pltpu.roll(x, shift=1, axis=1) * mask_l          # x[w-1]
    x_p1 = pltpu.roll(x, shift=s - 1, axis=1) * mask_r      # x[w+1]
    y = jnp.dot(w_ref[0], x_m1, preferred_element_type=jnp.float32)
    y = y + jnp.dot(w_ref[1], x, preferred_element_type=jnp.float32)
    y = y + jnp.dot(w_ref[2], x_p1, preferred_element_type=jnp.float32)
    return y


def _stats_kernel(x_ref, w_ref, ml_ref, mr_ref, stat_ref):
    """Pass 1: conv + per-batch-element partial sums for the BN statistics.

    stat_ref block (1, 2, Cout, 1) is resident across the tile axis (grid axis
    1, "arbitrary") and written back to HBM once per batch element.
    """
    @pl.when(pl.program_id(1) == 0)
    def _():
        stat_ref[...] = jnp.zeros_like(stat_ref)

    y = _conv3(x_ref[0], w_ref, ml_ref[...], mr_ref[...])       # (Cout, S) f32
    stat_ref[0, 0] += jnp.sum(y, axis=1, keepdims=True)         # (Cout, 1)
    stat_ref[0, 1] += jnp.sum(y * y, axis=1, keepdims=True)     # (Cout, 1)


def _norm_kernel(x_ref, w_ref, ml_ref, mr_ref, scale_ref, shift_ref, out_ref):
    """Pass 2: recompute conv, apply folded BN (scale/shift) and ReLU."""
    y = _conv3(x_ref[0], w_ref, ml_ref[...], mr_ref[...])       # (Cout, S) f32
    z = y * scale_ref[...] + shift_ref[...]                     # (Cout,1) bcast
    out_ref[0] = jnp.maximum(z, 0.0).astype(out_ref.dtype)


# --------------------------------------------------------------------------- #
# Host-side helpers
# --------------------------------------------------------------------------- #
def _device_kind():
    try:
        return jax.devices()[0].device_kind.lower()
    except Exception:
        return ""


def _default_compute_dtype():
    kind = _device_kind()
    if "v6" in kind or "v7" in kind:
        return jnp.bfloat16      # native bf16 VPU/MXU; halves HBM reads of x
    return jnp.float32           # v5e (no bf16 VPU) / unknown: stay f32


def _vmem_budget():
    """(per-step tile-footprint budget, vmem_limit_bytes) per TPU generation."""
    kind = _device_kind()
    if "v7" in kind:
        return 16 * 1024 * 1024, 40 * 1024 * 1024     # 64 MiB VMEM per TC
    if "v5" in kind or "v6" in kind:
        return 36 * 1024 * 1024, 96 * 1024 * 1024     # 128 MiB VMEM
    return 12 * 1024 * 1024, None                     # unknown: conservative


def _pick_spatial_tile(hw, width, cin, cout, in_itemsize, out_itemsize, budget):
    """Largest spatial tile that is row-aligned (multiple of W), lane-dense
    (multiple of 128), divides H*W, and keeps the per-step VMEM footprint
    (double-buffered x & out, in-register taps, f32 accumulator) <= budget."""
    per_s = (2 + 3) * cin * in_itemsize + 2 * cout * out_itemsize + cout * 4
    cap = max(budget // max(per_s, 1), width)
    step = width * 128 // math.gcd(width, 128)         # lcm(W, 128)
    best = 0
    t = step
    while t <= hw and t <= cap:
        if hw % t == 0:
            best = t
        t += step
    if best:
        return best
    # Fallback: row-aligned but not 128-lane-dense (perf hazard only).
    t = width
    while t <= hw and t <= cap:
        if hw % t == 0:
            best = t
        t += width
    return best if best else hw


# --------------------------------------------------------------------------- #
# Public wrapper
# --------------------------------------------------------------------------- #
def spatio_temporal_attention(x_nchw, conv_w, conv_b, bn_gamma, bn_beta,
                              *, compute_dtype=None, out_dtype=None):
    """Forward pass of SpatioTemporalAttention (conv -> train-mode BN -> ReLU).

    x_nchw: (N, Cin, H, W); conv_w: (Cout, Cin, 1, 3); conv_b: (Cout,);
    bn_gamma / bn_beta: (Cout,).  Returns (N, Cout, H, W) in `out_dtype`
    (default: x_nchw.dtype).

    conv_b is accepted for API parity but unused: training-mode BatchNorm
    subtracts the per-channel batch mean, which cancels the bias exactly.
    compute_dtype defaults to bfloat16 on v6e/v7x (f32 accumulation and f32 BN
    statistics are retained); pass jnp.float32 for bit-tight conv/BN math.
    """
    del conv_b
    N, Cin, H, W = x_nchw.shape
    Cout = conv_w.shape[0]
    HW = H * W
    out_dt = jnp.dtype(out_dtype) if out_dtype is not None else x_nchw.dtype
    cdt = (jnp.dtype(compute_dtype) if compute_dtype is not None
           else jnp.dtype(_default_compute_dtype()))

    # Free reshapes only (contiguous); flattened spatial lands on the lane axis.
    xf = x_nchw.reshape(N, Cin, HW).astype(cdt)
    # (Cout, Cin, 1, 3) -> (3, Cout, Cin)
    w3 = jnp.transpose(conv_w[:, :, 0, :], (2, 0, 1)).astype(cdt)

    budget, vmem_limit = _vmem_budget()
    S = _pick_spatial_tile(HW, W, Cin, Cout, cdt.itemsize, out_dt.itemsize,
                           budget)
    n_tiles = HW // S
    grid = (N, n_tiles)

    # Row-boundary edge masks; identical for every tile because S % W == 0,
    # so they are fetched once (constant index_map).
    col = jnp.arange(S, dtype=jnp.int32) % W
    mask_l = (col != 0).astype(cdt).reshape(1, S)
    mask_r = (col != W - 1).astype(cdt).reshape(1, S)

    x_spec = pl.BlockSpec((1, Cin, S), lambda n, t: (n, 0, t))
    w_spec = pl.BlockSpec((3, Cout, Cin), lambda n, t: (0, 0, 0))
    m_spec = pl.BlockSpec((1, S), lambda n, t: (0, 0))

    in_bytes = N * Cin * HW * cdt.itemsize
    out_bytes = N * Cout * HW * out_dt.itemsize
    conv_flops = 2 * N * HW * 3 * Cin * Cout

    # --- Pass 1: per-batch-element sum / sum-of-squares (f32), accumulated --
    # --- in the resident output block across the tile axis.               --
    stats = pl.pallas_call(
        _stats_kernel,
        grid=grid,
        in_specs=[x_spec, w_spec, m_spec, m_spec],
        out_specs=pl.BlockSpec((1, 2, Cout, 1), lambda n, t: (n, 0, 0, 0)),
        out_shape=jax.ShapeDtypeStruct((N, 2, Cout, 1), jnp.float32),
        compiler_params=pltpu.CompilerParams(
            dimension_semantics=("parallel", "arbitrary"),
            vmem_limit_bytes=vmem_limit),
        cost_estimate=pl.CostEstimate(
            flops=conv_flops + 4 * N * HW * Cout, transcendentals=0,
            bytes_accessed=in_bytes + N * 2 * Cout * 4),
    )(xf, w3, mask_l, mask_r)

    # Global (whole-batch) BN statistics, biased variance, folded to scale/shift.
    # TODO(synk): E[y^2]-E[y]^2 in f32 is cancellation-prone for huge N*H*W with
    # large means; switch to a Chan/Welford-style combine if that ever bites.
    count = jnp.asarray(N * HW, jnp.float32)
    mean = jnp.sum(stats[:, 0, :, 0], axis=0) / count                     # (Cout,)
    var = jnp.maximum(jnp.sum(stats[:, 1, :, 0], axis=0) / count - mean * mean,
                      0.0)
    scale = bn_gamma.astype(jnp.float32) * jax.lax.rsqrt(var + BN_EPS)
    shift = bn_beta.astype(jnp.float32) - mean * scale
    scale = scale.reshape(Cout, 1)
    shift = shift.reshape(Cout, 1)

    # --- Pass 2: conv + folded BN + ReLU; lane-dense NCHW output. -----------
    out = pl.pallas_call(
        _norm_kernel,
        grid=grid,
        in_specs=[x_spec, w_spec, m_spec, m_spec,
                  pl.BlockSpec((Cout, 1), lambda n, t: (0, 0)),
                  pl.BlockSpec((Cout, 1), lambda n, t: (0, 0))],
        out_specs=pl.BlockSpec((1, Cout, S), lambda n, t: (n, 0, t)),
        out_shape=jax.ShapeDtypeStruct((N, Cout, HW), out_dt),
        compiler_params=pltpu.CompilerParams(
            dimension_semantics=("parallel", "parallel"),
            vmem_limit_bytes=vmem_limit),
        cost_estimate=pl.CostEstimate(
            flops=conv_flops + 3 * N * HW * Cout, transcendentals=0,
            bytes_accessed=in_bytes + out_bytes),
    )(xf, w3, mask_l, mask_r, scale, shift)

    return out.reshape(N, Cout, H, W)


# --------------------------------------------------------------------------- #
# Reference (pure JAX) and self-test
# --------------------------------------------------------------------------- #
def reference(x_nchw, conv_w, conv_b, bn_gamma, bn_beta):
    y = jax.lax.conv_general_dilated(
        x_nchw, conv_w, window_strides=(1, 1), padding=((0, 0), (1, 1)),
        dimension_numbers=("NCHW", "OIHW", "NCHW"))
    y = y + conv_b.reshape(1, -1, 1, 1)
    mean = jnp.mean(y, axis=(0, 2, 3), keepdims=True)
    var = jnp.mean((y - mean) ** 2, axis=(0, 2, 3), keepdims=True)
    yhat = (y - mean) * jax.lax.rsqrt(var + BN_EPS)
    z = bn_gamma.reshape(1, -1, 1, 1) * yhat + bn_beta.reshape(1, -1, 1, 1)
    return jnp.maximum(z, 0.0)


if __name__ == "__main__":
    key = jax.random.PRNGKey(0)
    kx, kw, kb, kg, kbe = jax.random.split(key, 5)

    N, Cin, H, W = 2, 4, 16, 16
    Cout = 8

    x = jax.random.normal(kx, (N, Cin, H, W), dtype=jnp.float32)
    conv_w = jax.random.normal(kw, (Cout, Cin, 1, 3), dtype=jnp.float32) * 0.2
    conv_b = jax.random.normal(kb, (Cout,), dtype=jnp.float32) * 0.1
    bn_gamma = 1.0 + 0.1 * jax.random.normal(kg, (Cout,), dtype=jnp.float32)
    bn_beta = 0.1 * jax.random.normal(kbe, (Cout,), dtype=jnp.float32)

    ref = reference(x, conv_w, conv_b, bn_gamma, bn_beta)

    # Tight check: f32 compute path.
    out = spatio_temporal_attention(x, conv_w, conv_b, bn_gamma, bn_beta,
                                    compute_dtype=jnp.float32)
    out = jax.block_until_ready(out)
    assert out.shape == (N, Cout, H, W)
    assert jnp.allclose(out, ref, rtol=1e-4, atol=1e-4), (
        f"f32 path max err {jnp.max(jnp.abs(out - ref))}")

    # Default path (bf16 compute on v6e/v7x, f32 elsewhere): loose check.
    out_fast = spatio_temporal_attention(x, conv_w, conv_b, bn_gamma, bn_beta)
    out_fast = jax.block_until_ready(out_fast)
    assert out_fast.shape == (N, Cout, H, W)
    assert jnp.allclose(out_fast, ref, rtol=5e-2, atol=5e-2), (
        f"default path max err {jnp.max(jnp.abs(out_fast - ref))}")

    print("KERNEL_OK")
</pallas_src>

<mosaic_0001>
module attributes {stable_mosaic.version = 11 : i64} {
  func.func @_stats_kernel(%arg0: i32, %arg1: i32, %arg2: memref<1x4x256xf32, #tpu.memory_space<vmem>>, %arg3: memref<3x8x4xf32, #tpu.memory_space<vmem>>, %arg4: memref<1x256xf32, #tpu.memory_space<vmem>>, %arg5: memref<1x256xf32, #tpu.memory_space<vmem>>, %arg6: memref<1x2x8x1xf32, #tpu.memory_space<vmem>>) attributes {dimension_semantics = [#tpu.dimension_semantics<parallel>, #tpu.dimension_semantics<arbitrary>], iteration_bounds = array<i64: 2, 1>, scalar_prefetch = 0 : i64, scratch_operands = 0 : i64, tpu.core_type = #tpu.core_type<tc>, window_params = [{transform_indices = @transform_0, window_bounds = array<i64: 1, 4, 256>}, {pipeline_mode = #tpu.pipeline_mode<synchronous>, transform_indices = @transform_1, window_bounds = array<i64: 3, 8, 4>}, {pipeline_mode = #tpu.pipeline_mode<synchronous>, transform_indices = @transform_2, window_bounds = array<i64: 1, 256>}, {pipeline_mode = #tpu.pipeline_mode<synchronous>, transform_indices = @transform_3, window_bounds = array<i64: 1, 256>}, {transform_indices = @transform_4, window_bounds = array<i64: 1, 2, 8, 1>}]} {
    %c0_i32 = arith.constant 0 : i32
    %0 = arith.cmpi eq, %arg1, %c0_i32 : i32
    %1 = arith.extui %0 : i1 to i32
    %c0_i32_0 = arith.constant 0 : i32
    %2 = arith.cmpi ne, %1, %c0_i32_0 : i32
    scf.if %2 {
      %cst_34 = arith.constant 0.000000e+00 : f32
      %41 = vector.broadcast %cst_34 : f32 to vector<1x2x8x1xf32>
      %c0_35 = arith.constant 0 : index
      %c0_36 = arith.constant 0 : index
      %c0_37 = arith.constant 0 : index
      %c0_38 = arith.constant 0 : index
      %42 = vector.load %arg6[%c0_35, %c0_36, %c0_37, %c0_38] : memref<1x2x8x1xf32, #tpu.memory_space<vmem>>, vector<1x2x8x1xf32>
      tpu.vector_store %arg6[%c0_35, %c0_36, %c0_37, %c0_38], %41 {strides = array<i32>} : memref<1x2x8x1xf32, #tpu.memory_space<vmem>>, vector<1x2x8x1xf32>,
    } else {
    }
    %c0 = arith.constant 0 : index
    %c0_1 = arith.constant 0 : index
    %c0_2 = arith.constant 0 : index
    %3 = vector.load %arg2[%c0, %c0_1, %c0_2] : memref<1x4x256xf32, #tpu.memory_space<vmem>>, vector<1x4x256xf32>
    %4 = vector.shape_cast %3 : vector<1x4x256xf32> to vector<4x256xf32>
    %c0_3 = arith.constant 0 : index
    %c0_4 = arith.constant 0 : index
    %5 = vector.load %arg4[%c0_3, %c0_4] : memref<1x256xf32, #tpu.memory_space<vmem>>, vector<1x256xf32>
    %c0_5 = arith.constant 0 : index
    %c0_6 = arith.constant 0 : index
    %6 = vector.load %arg5[%c0_5, %c0_6] : memref<1x256xf32, #tpu.memory_space<vmem>>, vector<1x256xf32>
    %c1_i32 = arith.constant 1 : i32
    %7 = tpu.dynamic_rotate %4 by %c1_i32 dim 1 : vector<4x256xf32>, i32 -> vector<4x256xf32>
    %8 = vector.broadcast %5 : vector<1x256xf32> to vector<4x256xf32>
    %9 = arith.mulf %7, %8 : vector<4x256xf32>
    %c255_i32 = arith.constant 255 : i32
    %10 = tpu.dynamic_rotate %4 by %c255_i32 dim 1 : vector<4x256xf32>, i32 -> vector<4x256xf32>
    %11 = vector.broadcast %6 : vector<1x256xf32> to vector<4x256xf32>
    %12 = arith.mulf %10, %11 : vector<4x256xf32>
    %c0_7 = arith.constant 0 : index
    %c0_8 = arith.constant 0 : index
    %c0_9 = arith.constant 0 : index
    %13 = vector.load %arg3[%c0_7, %c0_8, %c0_9] : memref<3x8x4xf32, #tpu.memory_space<vmem>>, vector<1x8x4xf32>
    %14 = vector.shape_cast %13 : vector<1x8x4xf32> to vector<8x4xf32>
    %cst = arith.constant dense<0.000000e+00> : vector<8x256xf32>
    %15 = tpu.matmul %14, %9, %cst {dimension_numbers = #tpu.dot_dimension_numbers<[1], [0], [0], [1], [0, 0, 1, 1], [], []>} : vector<8x4xf32>, vector<4x256xf32>, vector<8x256xf32> -> vector<8x256xf32>
    %c1 = arith.constant 1 : index
    %c0_10 = arith.constant 0 : index
    %c0_11 = arith.constant 0 : index
    %16 = vector.load %arg3[%c1, %c0_10, %c0_11] : memref<3x8x4xf32, #tpu.memory_space<vmem>>, vector<1x8x4xf32>
    %17 = vector.shape_cast %16 : vector<1x8x4xf32> to vector<8x4xf32>
    %cst_12 = arith.constant dense<0.000000e+00> : vector<8x256xf32>
    %18 = tpu.matmul %17, %4, %cst_12 {dimension_numbers = #tpu.dot_dimension_numbers<[1], [0], [0], [1], [0, 0, 1, 1], [], []>} : vector<8x4xf32>, vector<4x256xf32>, vector<8x256xf32> -> vector<8x256xf32>
    %19 = arith.addf %15, %18 : vector<8x256xf32>
    %c2 = arith.constant 2 : index
    %c0_13 = arith.constant 0 : index
    %c0_14 = arith.constant 0 : index
    %20 = vector.load %arg3[%c2, %c0_13, %c0_14] : memref<3x8x4xf32, #tpu.memory_space<vmem>>, vector<1x8x4xf32>
    %21 = vector.shape_cast %20 : vector<1x8x4xf32> to vector<8x4xf32>
    %cst_15 = arith.constant dense<0.000000e+00> : vector<8x256xf32>
    %22 = tpu.matmul %21, %12, %cst_15 {dimension_numbers = #tpu.dot_dimension_numbers<[1], [0], [0], [1], [0, 0, 1, 1], [], []>} : vector<8x4xf32>, vector<4x256xf32>, vector<8x256xf32> -> vector<8x256xf32>
    %23 = arith.addf %19, %22 : vector<8x256xf32>
    %c0_16 = arith.constant 0 : index
    %c0_17 = arith.constant 0 : index
    %c0_18 = arith.constant 0 : index
    %c0_19 = arith.constant 0 : index
    %24 = vector.load %arg6[%c0_16, %c0_17, %c0_18, %c0_19] : memref<1x2x8x1xf32, #tpu.memory_space<vmem>>, vector<1x1x8x1xf32>
    %25 = vector.shape_cast %24 : vector<1x1x8x1xf32> to vector<8x1xf32>
    %cst_20 = arith.constant dense<0.000000e+00> : vector<8xf32>
    %26 = vector.multi_reduction <add>, %23, %cst_20 [1] : vector<8x256xf32> to vector<8xf32>
    %27 = vector.shape_cast %26 : vector<8xf32> to vector<8x1xf32>
    %28 = arith.addf %25, %27 : vector<8x1xf32>
    %c0_21 = arith.constant 0 : index
    %c0_22 = arith.constant 0 : index
    %c0_23 = arith.constant 0 : index
    %c0_24 = arith.constant 0 : index
    %29 = vector.load %arg6[%c0_21, %c0_22, %c0_23, %c0_24] : memref<1x2x8x1xf32, #tpu.memory_space<vmem>>, vector<1x1x8x1xf32>
    %30 = vector.shape_cast %29 : vector<1x1x8x1xf32> to vector<8x1xf32>
    %31 = vector.shape_cast %28 : vector<8x1xf32> to vector<1x1x8x1xf32>
    tpu.vector_store %arg6[%c0_21, %c0_22, %c0_23, %c0_24], %31 {strides = array<i32>} : memref<1x2x8x1xf32, #tpu.memory_space<vmem>>, vector<1x1x8x1xf32>,
    %c0_25 = arith.constant 0 : index
    %c1_26 = arith.constant 1 : index
    %c0_27 = arith.constant 0 : index
    %c0_28 = arith.constant 0 : index
    %32 = vector.load %arg6[%c0_25, %c1_26, %c0_27, %c0_28] : memref<1x2x8x1xf32, #tpu.memory_space<vmem>>, vector<1x1x8x1xf32>
    %33 = vector.shape_cast %32 : vector<1x1x8x1xf32> to vector<8x1xf32>
    %34 = arith.mulf %23, %23 : vector<8x256xf32>
    %cst_29 = arith.constant dense<0.000000e+00> : vector<8xf32>
    %35 = vector.multi_reduction <add>, %34, %cst_29 [1] : vector<8x256xf32> to vector<8xf32>
    %36 = vector.shape_cast %35 : vector<8xf32> to vector<8x1xf32>
    %37 = arith.addf %33, %36 : vector<8x1xf32>
    %c0_30 = arith.constant 0 : index
    %c1_31 = arith.constant 1 : index
    %c0_32 = arith.constant 0 : index
    %c0_33 = arith.constant 0 : index
    %38 = vector.load %arg6[%c0_30, %c1_31, %c0_32, %c0_33] : memref<1x2x8x1xf32, #tpu.memory_space<vmem>>, vector<1x1x8x1xf32>
    %39 = vector.shape_cast %38 : vector<1x1x8x1xf32> to vector<8x1xf32>
    %40 = vector.shape_cast %37 : vector<8x1xf32> to vector<1x1x8x1xf32>
    tpu.vector_store %arg6[%c0_30, %c1_31, %c0_32, %c0_33], %40 {strides = array<i32>} : memref<1x2x8x1xf32, #tpu.memory_space<vmem>>, vector<1x1x8x1xf32>,
    return
  }
  func.func @transform_0(%arg0: i32, %arg1: i32) -> (i32, i32, i32) {
    %c0_i32 = arith.constant 0 : i32
    %c0_i32_0 = arith.constant 0 : i32
    return %arg0, %c0_i32, %arg1 : i32, i32, i32
  }
  func.func @transform_1(%arg0: i32, %arg1: i32) -> (i32, i32, i32) {
    %c0_i32 = arith.constant 0 : i32
    %c0_i32_0 = arith.constant 0 : i32
    %c0_i32_1 = arith.constant 0 : i32
    %c0_i32_2 = arith.constant 0 : i32
    return %c0_i32, %c0_i32_0, %c0_i32_1 : i32, i32, i32
  }
  func.func @transform_2(%arg0: i32, %arg1: i32) -> (i32, i32) {
    %c0_i32 = arith.constant 0 : i32
    %c0_i32_0 = arith.constant 0 : i32
    %c0_i32_1 = arith.constant 0 : i32
    return %c0_i32, %c0_i32_0 : i32, i32
  }
  func.func @transform_3(%arg0: i32, %arg1: i32) -> (i32, i32) {
    %c0_i32 = arith.constant 0 : i32
    %c0_i32_0 = arith.constant 0 : i32
    %c0_i32_1 = arith.constant 0 : i32
    return %c0_i32, %c0_i32_0 : i32, i32
  }
  func.func @transform_4(%arg0: i32, %arg1: i32) -> (i32, i32, i32, i32) {
    %c0_i32 = arith.constant 0 : i32
    %c0_i32_0 = arith.constant 0 : i32
    %c0_i32_1 = arith.constant 0 : i32
    %c0_i32_2 = arith.constant 0 : i32
    return %arg0, %c0_i32, %c0_i32_0, %c0_i32_1 : i32, i32, i32, i32
  }
}

</mosaic_0001>

<bundles_post_ra>
// kernel: tpu_custom_call.1
= control target key start
LH: loop header
LB: loop body
LE: loop exit
PB: predicated region body
PF: predicated region fallthrough
CT: control target
= control target key end

     0   :  { %s723_s15 = smov 0   ;;  %s725_s16 = smov 0   ;;  %s792_s0 = inlined_call_operand.vmem [shape: f32[2,4,256], index: 0, kind: input, shape index: {}]   ;;  %s793_s1 = inlined_call_operand.vmem [shape: f32[3,8,4], index: 1, kind: input, shape index: {}]   ;;  %s794_s2 = inlined_call_operand.vmem [shape: f32[1,256], index: 2, kind: input, shape index: {}]   ;;  %s795_s3 = inlined_call_operand.vmem [shape: f32[1,256], index: 3, kind: input, shape index: {}]   ;;  %s796_s4 = inlined_call_operand.vmem [shape: f32[2,2,8,1], index: 4, kind: output, shape index: {}]  }
   0x1   :  { %s727_s17 = smov 0  }
   0x2 LB: > { %s26_s18 = sadd.s32 1, %s689_s16  ;;  %p617_p0 = scmp.ge.s32.totalorder %s693_s17, 1  ;;  %s693_s17 = sphi %s727_s17, %s14_s17   ;;  %s689_s16 = sphi %s725_s16, %s798_s16   ;;  %s685_s15 = sphi %s723_s15, %s797_s15  }
   0x3   : > { %p28_p1 = scmp.ge.s32.totalorder %s26_s18, 2  ;;  %p181_p2 = scmp.lt.s32.totalorder %s693_s17, 3 }
   0x5   : > { %s800_s18 = smov (%p28_p1, %s26_s18), 0  ;;  %p182_p3 = pnand %p617_p0, %p181_p2 }
   0x6   : > { %p212_p4 = scmp.lt.s32.totalorder (!%p182_p3), %s685_s15, 1  ;;  %v695_v0 = vmov (!%p182_p3), 0.0   ;;  %vm230_vm0 = vcmask (!%p182_p3), 7168   ;;  %s696_s27 = smov (!%p182_p3), 127   ;;  %vm288_vm1 = vcmask (!%p182_p3), 1043456   ;;  %v622_v3 = vld [vmem:[%s793_s1 + $0x8] sm:$0xff] (!%p182_p3)  ;;  %v243_v4 = vlaneseq (!%p182_p3) }
   0x7   : > { %185 = sbr.rel (%p182_p3) target bundleno = 514 (0x202), region = 36  ;;  %437 = vmatprep.mubr.f32.mxu0 (!%p182_p3), %v695_v0  ;;  %357 = vmatprep.mubr.f32.mxu1 (!%p182_p3), %v695_v0  ;;  %s697_s28 = smov (!%p182_p3), 1   ;;  %vm284_vm2 = vcmask (!%p182_p3), 31744   ;;  %v235_v9 = vld [vmem:[%s795_s3] sm:$0x3] (!%p182_p3)  ;;  %v629_v28 = vld [vmem:[%s793_s1 + $0x10] sm:$0xff] (!%p182_p3) }
   0x8   : > { %v250_v5 = vshrl.u32 (!%p182_p3), %v243_v4, 7  ;;  %v244_v6 = vand.u32 (!%p182_p3), 127, %v243_v4  ;;  %v234_v10 = vld [vmem:[%s794_s2] sm:$0x3] (!%p182_p3) }
   0x9   : > { %v281_v27 = vld [vmem:[%s793_s1] sm:$0xff] (!%p182_p3) }
   0xa   : > { %v251_v7 = vsub.s32 (!%p182_p3), 0, %v250_v5  ;;  %v255_v8 = vsub.s32 (!%p182_p3), 1, %v250_v5  ;;  %vm265_vm3 = vcmp.lt.s32.totalorder (!%p182_p3), %v244_v6, 127  ;;  %vm245_vm4 = vcmp.lt.s32.totalorder (!%p182_p3), %v244_v6, 1 }
   0xc   : > { %v276_v13 = vrot.slane (!%p182_p3), %v235_v9, %v255_v8  ;;  %v252_v14 = vrot.slane (!%p182_p3), %v234_v10, %v251_v7  ;;  %v256_v15 = vrot.slane (!%p182_p3), %v234_v10, %v255_v8  ;;  %v272_v16 = vrot.slane (!%p182_p3), %v235_v9, %v251_v7 }
   0xe   : > { %s802_s15 = smov (!%p212_p4, %s685_s15), 1 }
   0xf   : > { %s637_s19 = sshll.u32 %s802_s15, 3  ;;  %s638_s20 = sshll.u32 %s802_s15, 4 }
  0x10   : > { %s219_s23 = scalar_lea.vmem %s792_s0, %s637_s19  ;;  %s747_s26 = scalar_lea.vmem %s796_s4, %s638_s20 }
  0x11   : > { %v233_v1 = vld [vmem:[%s219_s23] sm:$0xff]  ;;  %231 = vst.msk [vmem:[%s747_s26] sm:$0xff] %vm230_vm0, %v695_v0  ;;  %232 = vst.msk [vmem:[%s747_s26 + $0x8] sm:$0xff] %vm230_vm0, %v695_v0 }
  0x12   : > { %261 = vrot.lane.b32.xlu1 %v233_v1, %s696_s27  ;;  %239 = vrot.lane.b32.xlu0 %v233_v1, %s697_s28  ;;  %v237_v2 = vcombine.high %v233_v1, %v233_v1 }
  0x14   : > { %623 = vmatprep.subr.msk.mxu1 %vm288_vm1, %v237_v2 }
  0x15   : > { %624 = vmatpush1.msk.msra.mxu1 %vm288_vm1, %v233_v1 }
  0x16   : > { %263 = vrot.lane.b32.xlu1 %v237_v2, %s696_s27  ;;  %241 = vrot.lane.b32.xlu0 %v237_v2, %s697_s28 }
  0x17   : > { %625 = vmatmul.mubr.msk.f32.vlgmr.msra.gmra.mrb[0].mxu1 %vm284_vm2, %v622_v3 }
  0x18   : > { %v528_v39 = vld [vmem:[%s747_s26] sm:$0xff]  ;;  %v633_v41 = vld [vmem:[%s747_s26 + $0x8] sm:$0xff] }
  0x84   : > { %v262_v11 = vpop.permute.xlu1 %261  ;;  %v240_v12 = vpop.permute.xlu0 %239 }
  0x88   : > { %v264_v17 = vpop.permute.xlu1 %263  ;;  %v242_v18 = vpop.permute.xlu0 %241 }
  0x89   : > { %v266_v19 = vsel %vm265_vm3, %v262_v11, %v264_v17  ;;  %v267_v20 = vsel %vm265_vm3, %v264_v17, %v262_v11  ;;  %v246_v21 = vsel %vm245_vm4, %v240_v12, %v242_v18  ;;  %v247_v22 = vsel %vm245_vm4, %v242_v18, %v240_v12 }
  0x8a   : > { %v280_v23 = vmul.f32 %v276_v13, %v267_v20  ;;  %v259_v24 = vmul.f32 %v252_v14, %v247_v22  ;;  %v260_v25 = vmul.f32 %v256_v15, %v246_v21  ;;  %v279_v26 = vmul.f32 %v272_v16, %v266_v19 }
  0x8c   : > { %626 = vmatprep.subr.msk.mxu0 %vm288_vm1, %v260_v25 }
  0x8d   : > { %627 = vmatpush1.msk.msra.mxu0 %vm288_vm1, %v259_v24 }
  0x8e   : > { %628 = vmatmul.mubr.msk.f32.vlgmr.msra.gmra.mrb[0].mxu0 %vm284_vm2, %v281_v27  ;;  %630 = vmatprep.subr.msk.mxu0 %vm288_vm1, %v280_v23 }
  0x8f   : > { %631 = vmatpush1.msk.msra.mxu0 %vm288_vm1, %v279_v26  ;;  %519 = vmatprep.mubr.f32.mxu0 %v695_v0 }
  0x96   : > { %632 = vmatmul.mubr.msk.f32.vlgmr.msra.gmra.mrb[0].mxu0 %vm284_vm2, %v629_v28 }
  0xea   : > { %v359_v29 = vpop.f32.mrb[0].mxu1 }
  0xeb   : > { %v361_v30 = vpop.f32.mrb[1].mxu1 }
 0x169   : > { %v521_v31 = vpop.f32.mrb[0].mxu0 }
 0x16a   : > { %v639_v32 = vadd.f32 %v521_v31, %v359_v29  ;;  %v523_v33 = vpop.f32.mrb[1].mxu0 }
 0x16b   : > { %v640_v34 = vadd.f32 %v523_v33, %v361_v30 }
 0x16c   : > { %v537_v35 = vmul.f32 %v639_v32, %v639_v32 }
 0x16d   : > { %v538_v36 = vmul.f32 %v640_v34, %v640_v34  ;;  %v529_v37 = vadd.f32 %v640_v34, %v639_v32 }
 0x16f   : > { %530 = vadd.xlane.f32.xlu0 %v529_v37  ;;  %v539_v38 = vadd.f32 %v538_v36, %v537_v35 }
 0x171   : > { %540 = vadd.xlane.f32.xlu1 %v539_v38 }
 0x1fc   : > { %v531_v40 = vpop.xlane.xlu0 %530 }
 0x1fd   : > { %v532_v42 = vadd.f32 %v531_v40, %v528_v39 }
 0x1fe   : > { %v541_v43 = vpop.xlane.xlu1 %540 }
 0x1ff   : > { %534 = vst.msk [vmem:[%s747_s26] sm:$0xff] %vm230_vm0, %v532_v42  ;;  %v542_v44 = vadd.f32 %v633_v41, %v541_v43 }
 0x201   : > { %634 = vst.msk [vmem:[%s747_s26 + $0x8] sm:$0xff] %vm230_vm0, %v542_v44 }
 0x202 PF: > { %s14_s17 = sadd.s32 1, %s693_s17   ;;  %s797_s15 = smov %s689_s16 }
 0x203   : > { %p11_p5 = scmp.ge.s32.totalorder %s14_s17, 4   ;;  %s798_s16 = smov %s800_s18 }
 0x205   :  { %13 = sbr.rel (!%p11_p5) target bundleno = 2 (0x2), region = 73 }

</bundles_post_ra>
